<compile_context>
chip_gen: v7x
topology: tpu7x:2x2x1
jax: 0.10.0
libtpu: 0.0.40
codegen_flags: <defaults>
</compile_context>

<pallas_src>
import functools

import jax
import jax.numpy as jnp
from jax.experimental import pallas as pl
from jax.experimental.pallas import tpu as pltpu


# --------------------------------------------------------------------------
# Haar DWT (J=1, 'haar').  For even-sized inputs the 'reflect' padding of
# pytorch_wavelets is a no-op for the length-2 Haar filters, so the DWT is
# exactly the orthonormal non-overlapping 2x2 block transform below.
# --------------------------------------------------------------------------
def haar_full(n):
    """Full Haar analysis matrix: rows [0:n/2] = lowpass, [n/2:n] = highpass."""
    h = n // 2
    s = (1.0 / jnp.sqrt(jnp.float32(2.0))).astype(jnp.float32)
    j = jnp.arange(h)
    m = jnp.zeros((n, n), jnp.float32)
    m = m.at[j, 2 * j].set(s).at[j, 2 * j + 1].set(s)
    m = m.at[h + j, 2 * j].set(s).at[h + j, 2 * j + 1].set(-s)
    return m


# --------------------------------------------------------------------------
# Pallas kernel
# --------------------------------------------------------------------------
def _facl_kernel(x_ref, kT_ref, wpos_ref, wneg_ref, loss_ref, *, m_pad, n_neg):
    """Single grid step: one matmul does every DWT, then fused reductions.

    x_ref rows:  [0:m_pad)            -> out images
                 [m_pad:2*m_pad)      -> GT images
                 [(2+i)*m_pad : ...)  -> negative i   (i in [0, n_neg))
    """
    # One MXU matmul = Haar DWT of every image slab (lane-dense, H*W wide).
    y = jnp.dot(x_ref[...], kT_ref[...], preferred_element_type=jnp.float32)

    ya = y[0:m_pad]                     # DWT(out)   -- sublane-aligned slice
    yg = y[m_pad:2 * m_pad]             # DWT(GT)

    # Positive term: LL and high-band L1 means (and CL.weight) are folded
    # into the per-column weights wpos.
    pos = jnp.sum(jnp.abs(ya - yg) * wpos_ref[...])

    # Negative term: accumulate a vreg-shaped partial sum across the
    # negatives, multiply by the per-column weights once, reduce once.
    # wneg zeroes the LL quadrant and folds 1/(n_neg * M * 3 * h2 * w2).
    acc = jnp.zeros_like(ya)
    for i in range(n_neg):              # static unroll (n_neg = 11), pure VPU
        yn = y[(2 + i) * m_pad:(3 + i) * m_pad]
        acc = acc + jnp.abs(ya - yn)
    neg = jnp.sum(acc * wneg_ref[...])

    # cl_loss_type == 'l1':  pos / (neg + 3e-7)   (weight already in wpos)
    loss_ref[0, 0] = pos / (neg + jnp.float32(3e-07))


def facl_pallas(x_all, kT, wpos, wneg, *, m_pad, n_neg):
    R, HW = x_all.shape
    return pl.pallas_call(
        functools.partial(_facl_kernel, m_pad=m_pad, n_neg=n_neg),
        out_shape=jax.ShapeDtypeStruct((1, 1), jnp.float32),
        grid_spec=pltpu.PrefetchScalarGridSpec(
            num_scalar_prefetch=0,
            grid=(1,),
            in_specs=[
                pl.BlockSpec((R, HW), lambda i: (0, 0)),      # all images, flat
                pl.BlockSpec((HW, HW), lambda i: (0, 0)),     # Kronecker Haar^T
                pl.BlockSpec((1, HW), lambda i: (0, 0)),      # pos weights
                pl.BlockSpec((1, HW), lambda i: (0, 0)),      # neg weights
            ],
            out_specs=pl.BlockSpec(memory_space=pltpu.MemorySpace.SMEM),
        ),
        compiler_params=pltpu.CompilerParams(
            dimension_semantics=("arbitrary",)),
    )(x_all, kT, wpos, wneg)


# ---------------- deterministic stand-in for the torchvision augmentation ----
def _rgb_to_gray(img):  # (B, 3, H, W) -> (B, 1, H, W)
    wgt = jnp.array([0.2989, 0.587, 0.114], jnp.float32).reshape(1, 3, 1, 1)
    return jnp.sum(img * wgt, axis=1, keepdims=True)


def _color_jitter(img, key, strength):
    kb, kc, ks = jax.random.split(key, 3)
    lo = max(0.0, 1.0 - strength)
    b = jax.random.uniform(kb, (), minval=lo, maxval=1.0 + strength)
    c = jax.random.uniform(kc, (), minval=lo, maxval=1.0 + strength)
    s = jax.random.uniform(ks, (), minval=lo, maxval=1.0 + strength)
    x = jnp.clip(img * b, 0.0, 1.0)                               # brightness
    mean = jnp.mean(_rgb_to_gray(x), axis=(2, 3), keepdims=True)
    x = jnp.clip(c * x + (1.0 - c) * mean, 0.0, 1.0)              # contrast
    x = jnp.clip(s * x + (1.0 - s) * _rgb_to_gray(x), 0.0, 1.0)   # saturation
    return x


def build_negatives(C_img, aug_len, key):
    # TODO(synk): torchvision ColorJitter/RandomGrayscale are stochastic (torch
    # RNG) and include hue jitter; replaced by deterministic JAX-keyed jitter
    # (brightness/contrast/saturation, fixed order, hue omitted) and a
    # deterministic 2-of-10 grayscale schedule (matches p=0.2 in expectation).
    strengths = [0.1, 0.2, 0.4, 0.6]
    negs = [C_img]
    for i in range(aug_len):
        k = jax.random.fold_in(key, i)
        x = _color_jitter(C_img, k, strengths[i % 4])
        if i % 5 == 4:
            x = jnp.broadcast_to(_rgb_to_gray(x), x.shape)
        negs.append(x)
    return jnp.stack(negs, axis=0)


# --------------------------------------------------------------------------
# Full FACL forward (jitted: augmentation + packing + kernel in one program)
# --------------------------------------------------------------------------
@functools.partial(jax.jit, static_argnames=("weight", "aug_len"))
def facl_loss(C_img, GT, out, key, weight=1.0, aug_len=10):
    B, Ch, H, W = out.shape
    h2, w2 = H // 2, W // 2
    HW = H * W
    M = B * Ch
    m_pad = ((M + 7) // 8) * 8        # sublane-tile aligned row groups

    negs = build_negatives(C_img.astype(jnp.float32), aug_len, key)
    n_neg = negs.shape[0]             # 1 + aug_len = 11 negatives

    # Stack every image slab as lane-dense rows and zero-pad M to m_pad
    # (pad rows are zero on every slab -> zero contribution to the L1 sums).
    out_f = out.reshape(1, M, HW).astype(jnp.float32)
    gt_f = GT.reshape(1, M, HW).astype(jnp.float32)
    neg_f = negs.reshape(n_neg, M, HW).astype(jnp.float32)
    stack = jnp.concatenate([out_f, gt_f, neg_f], axis=0)        # (2+n, M, HW)
    stack = jnp.pad(stack, ((0, 0), (0, m_pad - M), (0, 0)))
    x_all = stack.reshape((2 + n_neg) * m_pad, HW)

    # Kronecker Haar:  A_H @ X @ A_W^T  <=>  x_row @ kron(A_H, A_W)^T.
    # (Fine for H*W <= ~1024; larger images would use two batched matmuls.)
    kT = jnp.kron(haar_full(H), haar_full(W)).T                  # (HW, HW)

    # Per-column weight rows: fold the torch L1Loss 'mean' normalizations
    # (LL over M*h2*w2, high bands over M*3*h2*w2), the /n_neg average and
    # config.CL.weight:   weight * pos / (neg+eps) == (weight*pos)/(neg+eps).
    ll = ((jnp.arange(H) < h2)[:, None]
          & (jnp.arange(W) < w2)[None, :]).reshape(1, HW)
    w_ll = jnp.float32(1.0 / (M * h2 * w2))
    w_hi = jnp.float32(1.0 / (M * 3 * h2 * w2))
    wpos = (jnp.where(ll, w_ll, w_hi) * jnp.float32(weight)).astype(jnp.float32)
    wneg = jnp.where(ll, jnp.float32(0.0), w_hi / n_neg).astype(jnp.float32)

    loss = facl_pallas(x_all, kT, wpos, wneg, m_pad=m_pad, n_neg=n_neg)
    return loss[0, 0]


# --------------------------------------------------------------------------
# Pure-JAX reference (block-wise Haar) for a correctness check
# --------------------------------------------------------------------------
def _dwt_haar_ref(x):
    a = x[..., 0::2, 0::2]
    b = x[..., 0::2, 1::2]
    c = x[..., 1::2, 0::2]
    d = x[..., 1::2, 1::2]
    ll = (a + b + c + d) * 0.5
    lh = (a - b + c - d) * 0.5
    hl = (a + b - c - d) * 0.5
    hh = (a - b - c + d) * 0.5
    return ll, jnp.stack([lh, hl, hh], axis=2)


def facl_ref(C_img, GT, out, key, weight=1.0, aug_len=10):
    negs = build_negatives(C_img.astype(jnp.float32), aug_len, key)
    a_ll, a_h = _dwt_haar_ref(out.astype(jnp.float32))
    g_ll, g_h = _dwt_haar_ref(GT.astype(jnp.float32))
    pos = jnp.mean(jnp.abs(a_ll - g_ll)) + jnp.mean(jnp.abs(a_h - g_h))
    neg = jnp.float32(0.0)
    for i in range(negs.shape[0]):
        _, n_h = _dwt_haar_ref(negs[i])
        neg = neg + jnp.mean(jnp.abs(a_h - n_h))
    neg = neg / negs.shape[0]
    return pos / (neg + jnp.float32(3e-07)) * jnp.float32(weight)


if __name__ == "__main__":
    key = jax.random.PRNGKey(0)
    kc, kg, ko, ka = jax.random.split(key, 4)
    B, Ch, H, W = 2, 3, 16, 16
    C_img = jax.random.uniform(kc, (B, Ch, H, W), jnp.float32)   # conditioning
    GT = jax.random.uniform(kg, (B, Ch, H, W), jnp.float32)      # ground truth
    out = jax.random.uniform(ko, (B, Ch, H, W), jnp.float32)     # network output

    loss = facl_loss(C_img, GT, out, ka, weight=1.0)
    jax.block_until_ready(loss)

    ref = facl_ref(C_img, GT, out, ka, weight=1.0)
    if not bool(jnp.allclose(loss, ref, rtol=2e-2, atol=1e-5)):
        raise SystemExit(f"MISMATCH pallas={float(loss)} ref={float(ref)}")
    print("KERNEL_OK")
</pallas_src>

<mosaic_0001>
module attributes {stable_mosaic.version = 11 : i64} {
  func.func @_facl_kernel(%arg0: i32, %arg1: memref<104x256xf32, #tpu.memory_space<vmem>>, %arg2: memref<256x256xf32, #tpu.memory_space<vmem>>, %arg3: memref<1x256xf32, #tpu.memory_space<vmem>>, %arg4: memref<1x256xf32, #tpu.memory_space<vmem>>, %arg5: memref<1x1xf32, #tpu.memory_space<smem>>) attributes {dimension_semantics = [#tpu.dimension_semantics<arbitrary>], iteration_bounds = array<i64: 1>, scalar_prefetch = 0 : i64, scratch_operands = 0 : i64, tpu.core_type = #tpu.core_type<tc>, window_params = [{pipeline_mode = #tpu.pipeline_mode<synchronous>, transform_indices = @transform_0, window_bounds = array<i64: 104, 256>}, {pipeline_mode = #tpu.pipeline_mode<synchronous>, transform_indices = @transform_1, window_bounds = array<i64: 256, 256>}, {pipeline_mode = #tpu.pipeline_mode<synchronous>, transform_indices = @transform_2, window_bounds = array<i64: 1, 256>}, {pipeline_mode = #tpu.pipeline_mode<synchronous>, transform_indices = @transform_3, window_bounds = array<i64: 1, 256>}, {transform_indices = @transform_4, window_bounds = array<i64: 1, 1>}]} {
    %c0 = arith.constant 0 : index
    %c0_0 = arith.constant 0 : index
    %0 = vector.load %arg1[%c0, %c0_0] : memref<104x256xf32, #tpu.memory_space<vmem>>, vector<104x256xf32>
    %c0_1 = arith.constant 0 : index
    %c0_2 = arith.constant 0 : index
    %1 = vector.load %arg2[%c0_1, %c0_2] : memref<256x256xf32, #tpu.memory_space<vmem>>, vector<256x256xf32>
    %cst = arith.constant dense<0.000000e+00> : vector<104x256xf32>
    %2 = tpu.matmul %0, %1, %cst {dimension_numbers = #tpu.dot_dimension_numbers<[1], [0], [0], [1], [0, 0, 1, 1], [], []>} : vector<104x256xf32>, vector<256x256xf32>, vector<104x256xf32> -> vector<104x256xf32>
    %3 = vector.extract_strided_slice %2 {offsets = [0, 0], sizes = [8, 256], strides = [1, 1]} : vector<104x256xf32> to vector<8x256xf32>
    %4 = vector.extract_strided_slice %2 {offsets = [8, 0], sizes = [8, 256], strides = [1, 1]} : vector<104x256xf32> to vector<8x256xf32>
    %5 = arith.subf %3, %4 : vector<8x256xf32>
    %6 = math.absf %5 : vector<8x256xf32>
    %c0_3 = arith.constant 0 : index
    %c0_4 = arith.constant 0 : index
    %7 = vector.load %arg3[%c0_3, %c0_4] : memref<1x256xf32, #tpu.memory_space<vmem>>, vector<1x256xf32>
    %8 = vector.broadcast %7 : vector<1x256xf32> to vector<8x256xf32>
    %9 = arith.mulf %6, %8 : vector<8x256xf32>
    %10 = vector.shape_cast %9 : vector<8x256xf32> to vector<1x8x256xf32>
    %cst_5 = arith.constant dense<0.000000e+00> : vector<1xf32>
    %11 = vector.multi_reduction <add>, %10, %cst_5 [1, 2] : vector<1x8x256xf32> to vector<1xf32>
    %12 = vector.shape_cast %11 : vector<1xf32> to vector<1x1x1xf32>
    %13 = vector.extract %12[0, 0, 0] : f32 from vector<1x1x1xf32>
    %cst_6 = arith.constant 0.000000e+00 : f32
    %14 = vector.broadcast %cst_6 : f32 to vector<8x256xf32>
    %15 = vector.extract_strided_slice %2 {offsets = [16, 0], sizes = [8, 256], strides = [1, 1]} : vector<104x256xf32> to vector<8x256xf32>
    %16 = arith.subf %3, %15 : vector<8x256xf32>
    %17 = math.absf %16 : vector<8x256xf32>
    %18 = arith.addf %14, %17 : vector<8x256xf32>
    %19 = vector.extract_strided_slice %2 {offsets = [24, 0], sizes = [8, 256], strides = [1, 1]} : vector<104x256xf32> to vector<8x256xf32>
    %20 = arith.subf %3, %19 : vector<8x256xf32>
    %21 = math.absf %20 : vector<8x256xf32>
    %22 = arith.addf %18, %21 : vector<8x256xf32>
    %23 = vector.extract_strided_slice %2 {offsets = [32, 0], sizes = [8, 256], strides = [1, 1]} : vector<104x256xf32> to vector<8x256xf32>
    %24 = arith.subf %3, %23 : vector<8x256xf32>
    %25 = math.absf %24 : vector<8x256xf32>
    %26 = arith.addf %22, %25 : vector<8x256xf32>
    %27 = vector.extract_strided_slice %2 {offsets = [40, 0], sizes = [8, 256], strides = [1, 1]} : vector<104x256xf32> to vector<8x256xf32>
    %28 = arith.subf %3, %27 : vector<8x256xf32>
    %29 = math.absf %28 : vector<8x256xf32>
    %30 = arith.addf %26, %29 : vector<8x256xf32>
    %31 = vector.extract_strided_slice %2 {offsets = [48, 0], sizes = [8, 256], strides = [1, 1]} : vector<104x256xf32> to vector<8x256xf32>
    %32 = arith.subf %3, %31 : vector<8x256xf32>
    %33 = math.absf %32 : vector<8x256xf32>
    %34 = arith.addf %30, %33 : vector<8x256xf32>
    %35 = vector.extract_strided_slice %2 {offsets = [56, 0], sizes = [8, 256], strides = [1, 1]} : vector<104x256xf32> to vector<8x256xf32>
    %36 = arith.subf %3, %35 : vector<8x256xf32>
    %37 = math.absf %36 : vector<8x256xf32>
    %38 = arith.addf %34, %37 : vector<8x256xf32>
    %39 = vector.extract_strided_slice %2 {offsets = [64, 0], sizes = [8, 256], strides = [1, 1]} : vector<104x256xf32> to vector<8x256xf32>
    %40 = arith.subf %3, %39 : vector<8x256xf32>
    %41 = math.absf %40 : vector<8x256xf32>
    %42 = arith.addf %38, %41 : vector<8x256xf32>
    %43 = vector.extract_strided_slice %2 {offsets = [72, 0], sizes = [8, 256], strides = [1, 1]} : vector<104x256xf32> to vector<8x256xf32>
    %44 = arith.subf %3, %43 : vector<8x256xf32>
    %45 = math.absf %44 : vector<8x256xf32>
    %46 = arith.addf %42, %45 : vector<8x256xf32>
    %47 = vector.extract_strided_slice %2 {offsets = [80, 0], sizes = [8, 256], strides = [1, 1]} : vector<104x256xf32> to vector<8x256xf32>
    %48 = arith.subf %3, %47 : vector<8x256xf32>
    %49 = math.absf %48 : vector<8x256xf32>
    %50 = arith.addf %46, %49 : vector<8x256xf32>
    %51 = vector.extract_strided_slice %2 {offsets = [88, 0], sizes = [8, 256], strides = [1, 1]} : vector<104x256xf32> to vector<8x256xf32>
    %52 = arith.subf %3, %51 : vector<8x256xf32>
    %53 = math.absf %52 : vector<8x256xf32>
    %54 = arith.addf %50, %53 : vector<8x256xf32>
    %55 = vector.extract_strided_slice %2 {offsets = [96, 0], sizes = [8, 256], strides = [1, 1]} : vector<104x256xf32> to vector<8x256xf32>
    %56 = arith.subf %3, %55 : vector<8x256xf32>
    %57 = math.absf %56 : vector<8x256xf32>
    %58 = arith.addf %54, %57 : vector<8x256xf32>
    %c0_7 = arith.constant 0 : index
    %c0_8 = arith.constant 0 : index
    %59 = vector.load %arg4[%c0_7, %c0_8] : memref<1x256xf32, #tpu.memory_space<vmem>>, vector<1x256xf32>
    %60 = vector.broadcast %59 : vector<1x256xf32> to vector<8x256xf32>
    %61 = arith.mulf %58, %60 : vector<8x256xf32>
    %62 = vector.shape_cast %61 : vector<8x256xf32> to vector<1x8x256xf32>
    %cst_9 = arith.constant dense<0.000000e+00> : vector<1xf32>
    %63 = vector.multi_reduction <add>, %62, %cst_9 [1, 2] : vector<1x8x256xf32> to vector<1xf32>
    %64 = vector.shape_cast %63 : vector<1xf32> to vector<1x1x1xf32>
    %65 = vector.extract %64[0, 0, 0] : f32 from vector<1x1x1xf32>
    %cst_10 = arith.constant 3.000000e-07 : f32
    %66 = arith.addf %65, %cst_10 : f32
    %67 = arith.divf %13, %66 : f32
    %c0_11 = arith.constant 0 : index
    %c0_12 = arith.constant 0 : index
    %68 = memref.load %arg5[%c0_11, %c0_12] : memref<1x1xf32, #tpu.memory_space<smem>>
    memref.store %67, %arg5[%c0_11, %c0_12] : memref<1x1xf32, #tpu.memory_space<smem>>
    return
  }
  func.func @transform_0(%arg0: i32) -> (i32, i32) {
    %c0_i32 = arith.constant 0 : i32
    %c0_i32_0 = arith.constant 0 : i32
    %c0_i32_1 = arith.constant 0 : i32
    return %c0_i32, %c0_i32_0 : i32, i32
  }
  func.func @transform_1(%arg0: i32) -> (i32, i32) {
    %c0_i32 = arith.constant 0 : i32
    %c0_i32_0 = arith.constant 0 : i32
    %c0_i32_1 = arith.constant 0 : i32
    return %c0_i32, %c0_i32_0 : i32, i32
  }
  func.func @transform_2(%arg0: i32) -> (i32, i32) {
    %c0_i32 = arith.constant 0 : i32
    %c0_i32_0 = arith.constant 0 : i32
    %c0_i32_1 = arith.constant 0 : i32
    return %c0_i32, %c0_i32_0 : i32, i32
  }
  func.func @transform_3(%arg0: i32) -> (i32, i32) {
    %c0_i32 = arith.constant 0 : i32
    %c0_i32_0 = arith.constant 0 : i32
    %c0_i32_1 = arith.constant 0 : i32
    return %c0_i32, %c0_i32_0 : i32, i32
  }
  func.func @transform_4(%arg0: i32) -> (i32, i32) {
    %c0_i32 = arith.constant 0 : i32
    %c0_i32_0 = arith.constant 0 : i32
    %c0_i32_1 = arith.constant 0 : i32
    return %c0_i32, %c0_i32_0 : i32, i32
  }
}

</mosaic_0001>

<bundles_post_ra>
// kernel: facl_loss.1
= control target key start
LH: loop header
LB: loop body
LE: loop exit
PB: predicated region body
PF: predicated region fallthrough
CT: control target
= control target key end

     0   :  { %s887_s0 = inlined_call_operand.vmem [shape: f32[104,256], index: 0, kind: input, shape index: {}]   ;;  %s888_s1 = inlined_call_operand.vmem [shape: f32[256,256], index: 1, kind: input, shape index: {}]   ;;  %s889_s2 = inlined_call_operand.vmem [shape: f32[1,256], index: 2, kind: input, shape index: {}]   ;;  %s890_s3 = inlined_call_operand.vmem [shape: f32[1,256], index: 3, kind: input, shape index: {}]   ;;  %s891_s4 = inlined_call_operand.hbm [shape: f32[1,1], index: 4, kind: output, shape index: {}]  }
   0x1   :  { %v45_v0 = vld [vmem:[%s888_s1 + $0x8] sm:$0xff]  ;;  %v47_v1 = vld [vmem:[%s888_s1 + $0x18] sm:$0xff]  ;;  %v44_v2 = vld [vmem:[%s888_s1] sm:$0xff] }
   0x2   :  { %v389_v3 = vpack.c.bf16 %v47_v1, %v45_v0  ;;  %v46_v4 = vld [vmem:[%s888_s1 + $0x10] sm:$0xff]  ;;  %v49_v5 = vld [vmem:[%s888_s1 + $0x28] sm:$0xff]  ;;  %v51_v6 = vld [vmem:[%s888_s1 + $0x38] sm:$0xff] }
   0x3   :  { %v391_v7 = vpack.c.bf16 %v46_v4, %v44_v2  ;;  %v393_v8 = vpack.c.bf16 %v51_v6, %v49_v5  ;;  %v48_v9 = vld [vmem:[%s888_s1 + $0x20] sm:$0xff]  ;;  %v50_v10 = vld [vmem:[%s888_s1 + $0x30] sm:$0xff]  ;;  %v53_v11 = vld [vmem:[%s888_s1 + $0x48] sm:$0xff] }
   0x4   :  { %390 = vmatprep.subr.bf16.mxu0 %v389_v3  ;;  %453 = vmatprep.subr.bf16.mxu1 %v389_v3  ;;  %v55_v12 = vld [vmem:[%s888_s1 + $0x58] sm:$0xff]  ;;  %v395_v13 = vpack.c.bf16 %v50_v10, %v48_v9  ;;  %v52_v15 = vld [vmem:[%s888_s1 + $0x40] sm:$0xff]  ;;  %v54_v16 = vld [vmem:[%s888_s1 + $0x50] sm:$0xff] }
   0x5   :  { %392 = vmatpush1.bf16.msra.mxu0 %v391_v7  ;;  %469 = vmatpush1.bf16.msra.mxu1 %v391_v7  ;;  %v397_v14 = vpack.c.bf16 %v55_v12, %v53_v11  ;;  %v57_v17 = vld [vmem:[%s888_s1 + $0x68] sm:$0xff]  ;;  %v59_v18 = vld [vmem:[%s888_s1 + $0x78] sm:$0xff]  ;;  %v399_v19 = vpack.c.bf16 %v54_v16, %v52_v15  ;;  %v56_v21 = vld [vmem:[%s888_s1 + $0x60] sm:$0xff] }
   0x6   :  { %394 = vmatprep.subr.bf16.mxu0 %v393_v8  ;;  %454 = vmatprep.subr.bf16.mxu1 %v393_v8  ;;  %v401_v20 = vpack.c.bf16 %v59_v18, %v57_v17  ;;  %v58_v22 = vld [vmem:[%s888_s1 + $0x70] sm:$0xff]  ;;  %v61_v23 = vld [vmem:[%s888_s1 + $0x88] sm:$0xff]  ;;  %v63_v24 = vld [vmem:[%s888_s1 + $0x98] sm:$0xff] }
   0x7   :  { %v403_v25 = vpack.c.bf16 %v58_v22, %v56_v21  ;;  %v405_v26 = vpack.c.bf16 %v63_v24, %v61_v23  ;;  %v60_v27 = vld [vmem:[%s888_s1 + $0x80] sm:$0xff]  ;;  %v62_v28 = vld [vmem:[%s888_s1 + $0x90] sm:$0xff]  ;;  %v65_v29 = vld [vmem:[%s888_s1 + $0xa8] sm:$0xff] }
   0x8   :  { %v67_v30 = vld [vmem:[%s888_s1 + $0xb8] sm:$0xff]  ;;  %v407_v31 = vpack.c.bf16 %v62_v28, %v60_v27  ;;  %v64_v33 = vld [vmem:[%s888_s1 + $0xa0] sm:$0xff]  ;;  %v66_v34 = vld [vmem:[%s888_s1 + $0xb0] sm:$0xff] }
   0x9   :  { %396 = vmatpush1.bf16.msra.mxu0 %v395_v13  ;;  %470 = vmatpush1.bf16.msra.mxu1 %v395_v13  ;;  %v409_v32 = vpack.c.bf16 %v67_v30, %v65_v29  ;;  %v69_v35 = vld [vmem:[%s888_s1 + $0xc8] sm:$0xff]  ;;  %v71_v36 = vld [vmem:[%s888_s1 + $0xd8] sm:$0xff]  ;;  %v411_v37 = vpack.c.bf16 %v66_v34, %v64_v33  ;;  %v68_v38 = vld [vmem:[%s888_s1 + $0xc0] sm:$0xff] }
   0xa   :  { %398 = vmatprep.subr.bf16.mxu0 %v397_v14  ;;  %455 = vmatprep.subr.bf16.mxu1 %v397_v14  ;;  %v413_v39 = vpack.c.bf16 %v71_v36, %v69_v35  ;;  %v70_v40 = vld [vmem:[%s888_s1 + $0xd0] sm:$0xff]  ;;  %v19_v41 = vld [vmem:[%s887_s0 + $0x8] sm:$0xff]  ;;  %v33_v42 = vld [vmem:[%s887_s0 + $0x78] sm:$0xff] }
   0xb   :  { %v73_v43 = vld [vmem:[%s888_s1 + $0xe8] sm:$0xff]  ;;  %v75_v44 = vld [vmem:[%s888_s1 + $0xf8] sm:$0xff]  ;;  %172 = vmatprep.mubr.f32.mxu0 %v19_v41  ;;  %214 = vmatprep.mubr.f32.mxu1 %v33_v42  ;;  %v415_v45 = vpack.c.bf16 %v70_v40, %v68_v38  ;;  %v72_v47 = vld [vmem:[%s888_s1 + $0xe0] sm:$0xff] }
   0xc   :  { %v417_v46 = vpack.c.bf16 %v75_v44, %v73_v43  ;;  %v74_v48 = vld [vmem:[%s888_s1 + $0xf0] sm:$0xff]  ;;  %v77_v49 = vld [vmem:[%s888_s1 + $0x108] sm:$0xff]  ;;  %v79_v50 = vld [vmem:[%s888_s1 + $0x118] sm:$0xff] }
   0xd   :  { %400 = vmatpush1.bf16.msra.mxu0 %v399_v19  ;;  %471 = vmatpush1.bf16.msra.mxu1 %v399_v19  ;;  %v419_v51 = vpack.c.bf16 %v74_v48, %v72_v47  ;;  %v421_v52 = vpack.c.bf16 %v79_v50, %v77_v49  ;;  %v76_v53 = vld [vmem:[%s888_s1 + $0x100] sm:$0xff]  ;;  %v78_v54 = vld [vmem:[%s888_s1 + $0x110] sm:$0xff]  ;;  %v81_v55 = vld [vmem:[%s888_s1 + $0x128] sm:$0xff] }
   0xe   :  { %402 = vmatprep.subr.bf16.mxu0 %v401_v20  ;;  %456 = vmatprep.subr.bf16.mxu1 %v401_v20  ;;  %v83_v56 = vld [vmem:[%s888_s1 + $0x138] sm:$0xff] }
  0x11   :  { %404 = vmatpush1.bf16.msra.mxu0 %v403_v25  ;;  %472 = vmatpush1.bf16.msra.mxu1 %v403_v25 }
  0x12   :  { %406 = vmatprep.subr.bf16.mxu0 %v405_v26  ;;  %457 = vmatprep.subr.bf16.mxu1 %v405_v26 }
  0x15   :  { %408 = vmatpush1.bf16.msra.mxu0 %v407_v31  ;;  %473 = vmatpush1.bf16.msra.mxu1 %v407_v31 }
  0x16   :  { %410 = vmatprep.subr.bf16.mxu0 %v409_v32  ;;  %458 = vmatprep.subr.bf16.mxu1 %v409_v32 }
  0x19   :  { %412 = vmatpush1.bf16.msra.mxu0 %v411_v37  ;;  %474 = vmatpush1.bf16.msra.mxu1 %v411_v37 }
  0x1a   :  { %414 = vmatprep.subr.bf16.mxu0 %v413_v39  ;;  %459 = vmatprep.subr.bf16.mxu1 %v413_v39 }
  0x1d   :  { %416 = vmatpush1.bf16.msra.mxu0 %v415_v45  ;;  %475 = vmatpush1.bf16.msra.mxu1 %v415_v45 }
  0x1e   :  { %418 = vmatprep.subr.bf16.mxu0 %v417_v46  ;;  %460 = vmatprep.subr.bf16.mxu1 %v417_v46 }
  0x1f   :  { %9 = vsyncpa [#allocation3], 0  ;;  %v423_v57 = vpack.c.bf16 %v78_v54, %v76_v53  ;;  %v425_v58 = vpack.c.bf16 %v83_v56, %v81_v55  ;;  %v80_v59 = vld [vmem:[%s888_s1 + $0x120] sm:$0xff]  ;;  %v82_v60 = vld [vmem:[%s888_s1 + $0x130] sm:$0xff]  ;;  %s494_s19 = scalar_lea.hbm %s891_s4, 16 }
  0x20   :  { %v85_v61 = vld [vmem:[%s888_s1 + $0x148] sm:$0xff]  ;;  %v87_v62 = vld [vmem:[%s888_s1 + $0x158] sm:$0xff]  ;;  %v427_v63 = vpack.c.bf16 %v82_v60, %v80_v59  ;;  %v84_v1 = vld [vmem:[%s888_s1 + $0x140] sm:$0xff]  ;;  %p495_p0 = scmp.ne.s32.totalorder %s891_s4, %s494_s19  ;;  %p498_p1 = scmp.lt.u32.totalorder %s494_s19, %s891_s4 }
  0x21   :  { %420 = vmatpush1.bf16.msra.mxu0 %v419_v51  ;;  %476 = vmatpush1.bf16.msra.mxu1 %v419_v51  ;;  %v429_v0 = vpack.c.bf16 %v87_v62, %v85_v61  ;;  %v86_v2 = vld [vmem:[%s888_s1 + $0x150] sm:$0xff]  ;;  %v89_v3 = vld [vmem:[%s888_s1 + $0x168] sm:$0xff]  ;;  %v91_v4 = vld [vmem:[%s888_s1 + $0x178] sm:$0xff] }
  0x22   :  { %422 = vmatprep.subr.bf16.mxu0 %v421_v52  ;;  %461 = vmatprep.subr.bf16.mxu1 %v421_v52  ;;  %v431_v5 = vpack.c.bf16 %v86_v2, %v84_v1  ;;  %v433_v6 = vpack.c.bf16 %v91_v4, %v89_v3  ;;  %v88_v7 = vld [vmem:[%s888_s1 + $0x160] sm:$0xff]  ;;  %v90_v8 = vld [vmem:[%s888_s1 + $0x170] sm:$0xff]  ;;  %v93_v9 = vld [vmem:[%s888_s1 + $0x188] sm:$0xff]  ;;  %p500_p2 = pnand %p498_p1, %p495_p0 }
  0x23   :  { %v95_v10 = vld [vmem:[%s888_s1 + $0x198] sm:$0xff]  ;;  %v435_v11 = vpack.c.bf16 %v90_v8, %v88_v7  ;;  %v92_v13 = vld [vmem:[%s888_s1 + $0x180] sm:$0xff]  ;;  %v94_v14 = vld [vmem:[%s888_s1 + $0x190] sm:$0xff] }
  0x24   :  { %v437_v12 = vpack.c.bf16 %v95_v10, %v93_v9  ;;  %v97_v15 = vld [vmem:[%s888_s1 + $0x1a8] sm:$0xff]  ;;  %v99_v16 = vld [vmem:[%s888_s1 + $0x1b8] sm:$0xff]  ;;  %v439_v17 = vpack.c.bf16 %v94_v14, %v92_v13  ;;  %v96_v19 = vld [vmem:[%s888_s1 + $0x1a0] sm:$0xff] }
  0x25   :  { %424 = vmatpush1.bf16.msra.mxu0 %v423_v57  ;;  %477 = vmatpush1.bf16.msra.mxu1 %v423_v57  ;;  %v441_v18 = vpack.c.bf16 %v99_v16, %v97_v15  ;;  %v98_v20 = vld [vmem:[%s888_s1 + $0x1b0] sm:$0xff]  ;;  %v101_v21 = vld [vmem:[%s888_s1 + $0x1c8] sm:$0xff]  ;;  %v103_v22 = vld [vmem:[%s888_s1 + $0x1d8] sm:$0xff] }
  0x26   :  { %426 = vmatprep.subr.bf16.mxu0 %v425_v58  ;;  %462 = vmatprep.subr.bf16.mxu1 %v425_v58  ;;  %v443_v23 = vpack.c.bf16 %v98_v20, %v96_v19  ;;  %v445_v24 = vpack.c.bf16 %v103_v22, %v101_v21  ;;  %v100_v25 = vld [vmem:[%s888_s1 + $0x1c0] sm:$0xff]  ;;  %v102_v26 = vld [vmem:[%s888_s1 + $0x1d0] sm:$0xff]  ;;  %v105_v27 = vld [vmem:[%s888_s1 + $0x1e8] sm:$0xff]  ;;  %v257_v58 = vlaneseq }
  0x27   :  { %v107_v28 = vld [vmem:[%s888_s1 + $0x1f8] sm:$0xff]  ;;  %v447_v29 = vpack.c.bf16 %v102_v26, %v100_v25  ;;  %v104_v31 = vld [vmem:[%s888_s1 + $0x1e0] sm:$0xff]  ;;  %v106_v32 = vld [vmem:[%s888_s1 + $0x1f0] sm:$0xff] }
  0x28   :  { %v449_v30 = vpack.c.bf16 %v107_v28, %v105_v27  ;;  %v451_v33 = vpack.c.bf16 %v106_v32, %v104_v31  ;;  %v18_v34 = vld [vmem:[%s887_s0] sm:$0xff]  ;;  %v32_v35 = vld [vmem:[%s887_s0 + $0x70] sm:$0xff]  ;;  %v21_v36 = vld [vmem:[%s887_s0 + $0x18] sm:$0xff]  ;;  %v802_v59 = vshrl.u32 %v257_v58, 7 }
  0x29   :  { %428 = vmatpush1.bf16.msra.mxu0 %v427_v63  ;;  %478 = vmatpush1.bf16.msra.mxu1 %v427_v63  ;;  %v35_v37 = vld [vmem:[%s887_s0 + $0x88] sm:$0xff]  ;;  %v20_v38 = vld [vmem:[%s887_s0 + $0x10] sm:$0xff]  ;;  %v34_v39 = vld [vmem:[%s887_s0 + $0x80] sm:$0xff] }
  0x2a   :  { %430 = vmatprep.subr.bf16.mxu0 %v429_v0  ;;  %463 = vmatprep.subr.bf16.mxu1 %v429_v0  ;;  %v23_v40 = vld [vmem:[%s887_s0 + $0x28] sm:$0xff]  ;;  %v37_v41 = vld [vmem:[%s887_s0 + $0x98] sm:$0xff]  ;;  %v22_v42 = vld [vmem:[%s887_s0 + $0x20] sm:$0xff]  ;;  %v259_v1 = vsub.s32 0, %v802_v59  ;;  %v263_v4 = vsub.s32 1, %v802_v59 }
  0x2b   :  { %v36_v43 = vld [vmem:[%s887_s0 + $0x90] sm:$0xff]  ;;  %v25_v44 = vld [vmem:[%s887_s0 + $0x38] sm:$0xff]  ;;  %v39_v45 = vld [vmem:[%s887_s0 + $0xa8] sm:$0xff] }
  0x2c   :  { %v24_v46 = vld [vmem:[%s887_s0 + $0x30] sm:$0xff]  ;;  %v38_v47 = vld [vmem:[%s887_s0 + $0xa0] sm:$0xff]  ;;  %v27_v48 = vld [vmem:[%s887_s0 + $0x48] sm:$0xff] }
  0x2d   :  { %432 = vmatpush1.bf16.msra.mxu0 %v431_v5  ;;  %479 = vmatpush1.bf16.msra.mxu1 %v431_v5  ;;  %v41_v49 = vld [vmem:[%s887_s0 + $0xb8] sm:$0xff]  ;;  %v26_v50 = vld [vmem:[%s887_s0 + $0x40] sm:$0xff]  ;;  %v40_v51 = vld [vmem:[%s887_s0 + $0xb0] sm:$0xff] }
  0x2e   :  { %434 = vmatprep.subr.bf16.mxu0 %v433_v6  ;;  %464 = vmatprep.subr.bf16.mxu1 %v433_v6  ;;  %v29_v52 = vld [vmem:[%s887_s0 + $0x58] sm:$0xff]  ;;  %v43_v53 = vld [vmem:[%s887_s0 + $0xc8] sm:$0xff]  ;;  %v28_v54 = vld [vmem:[%s887_s0 + $0x50] sm:$0xff] }
  0x2f   :  { %v42_v55 = vld [vmem:[%s887_s0 + $0xc0] sm:$0xff]  ;;  %v31_v56 = vld [vmem:[%s887_s0 + $0x68] sm:$0xff] }
  0x30   :  { %v30_v57 = vld [vmem:[%s887_s0 + $0x60] sm:$0xff] }
  0x31   :  { %436 = vmatpush1.bf16.msra.mxu0 %v435_v11  ;;  %480 = vmatpush1.bf16.msra.mxu1 %v435_v11  ;;  %v255_v3 = vld [vmem:[%s889_s2] sm:$0x3] }
  0x32   :  { %438 = vmatprep.subr.bf16.mxu0 %v437_v12  ;;  %465 = vmatprep.subr.bf16.mxu1 %v437_v12  ;;  %v260_v11 = vrot.slane %v255_v3, %v259_v1  ;;  %v264_v14 = vrot.slane %v255_v3, %v263_v4 }
  0x35   :  { %440 = vmatpush1.bf16.msra.mxu0 %v439_v17  ;;  %481 = vmatpush1.bf16.msra.mxu1 %v439_v17 }
  0x36   :  { %442 = vmatprep.subr.bf16.mxu0 %v441_v18  ;;  %466 = vmatprep.subr.bf16.mxu1 %v441_v18 }
  0x39   :  { %444 = vmatpush1.bf16.msra.mxu0 %v443_v23  ;;  %482 = vmatpush1.bf16.msra.mxu1 %v443_v23 }
  0x3a   :  { %446 = vmatprep.subr.bf16.mxu0 %v445_v24  ;;  %467 = vmatprep.subr.bf16.mxu1 %v445_v24 }
  0x3d   :  { %448 = vmatpush1.bf16.msra.mxu0 %v447_v29  ;;  %483 = vmatpush1.bf16.msra.mxu1 %v447_v29 }
  0x3e   :  { %450 = vmatprep.subr.bf16.mxu0 %v449_v30  ;;  %468 = vmatprep.subr.bf16.mxu1 %v449_v30 }
  0x41   :  { %452 = vmatpush1.bf16.msra.mxu0 %v451_v33  ;;  %484 = vmatpush1.bf16.msra.mxu1 %v451_v33 }
  0x44   :  { %173 = vmatmul.mubr.f32.vlgmr.msra.gmra.mrb[0].mxu0 %v18_v34  ;;  %215 = vmatmul.mubr.f32.vlgmr.msra.gmra.mrb[0].mxu1 %v32_v35 }
  0x45   :  { %178 = vmatprep.mubr.f32.mxu0 %v21_v36  ;;  %220 = vmatprep.mubr.f32.mxu1 %v35_v37 }
  0x48   :  { %179 = vmatmul.mubr.f32.gmra.mrb[2].mxu0 %v20_v38  ;;  %221 = vmatmul.mubr.f32.gmra.mrb[2].mxu1 %v34_v39 }
  0x49   :  { %184 = vmatprep.mubr.f32.mxu0 %v23_v40  ;;  %226 = vmatprep.mubr.f32.mxu1 %v37_v41 }
  0x4c   :  { %185 = vmatmul.mubr.f32.gmra.mrb[4].mxu0 %v22_v42  ;;  %227 = vmatmul.mubr.f32.gmra.mrb[4].mxu1 %v36_v43 }
  0x4d   :  { %190 = vmatprep.mubr.f32.mxu0 %v25_v44  ;;  %232 = vmatprep.mubr.f32.mxu1 %v39_v45 }
  0x50   :  { %191 = vmatmul.mubr.f32.gmra.mrb[6].mxu0 %v24_v46  ;;  %233 = vmatmul.mubr.f32.gmra.mrb[6].mxu1 %v38_v47 }
  0x51   :  { %196 = vmatprep.mubr.f32.mxu0 %v27_v48  ;;  %238 = vmatprep.mubr.f32.mxu1 %v41_v49 }
  0x54   :  { %197 = vmatmul.mubr.f32.gmra.mrb[8].mxu0 %v26_v50  ;;  %239 = vmatmul.mubr.f32.gmra.mrb[8].mxu1 %v40_v51 }
  0x55   :  { %202 = vmatprep.mubr.f32.mxu0 %v29_v52  ;;  %244 = vmatprep.mubr.f32.mxu1 %v43_v53 }
  0x58   :  { %203 = vmatmul.mubr.f32.gmra.mrb[10].mxu0 %v28_v54  ;;  %245 = vmatmul.mubr.f32.gmra.mrb[10].mxu1 %v42_v55 }
  0x59   :  { %208 = vmatprep.mubr.f32.mxu0 %v31_v56 }
  0x5c   :  { %209 = vmatmul.mubr.f32.gmra.mrb[12].mxu0 %v30_v57 }
 0x117   :  { %v804_v60 = vpop.f32.mrb[0].mxu0  ;;  %v806_v61 = vpop.f32.mrb[0].mxu1 }
 0x118   :  { %v309_v62 = vsub.f32 %v804_v60, %v806_v61  ;;  %v810_v63 = vpop.f32.mrb[1].mxu0  ;;  %v812_v0 = vpop.f32.mrb[1].mxu1 }
 0x119   :  { %v310_v2 = vsub.f32 %v810_v63, %v812_v0 }
 0x11b   :  { %v180_v5 = vpop.f32.mrb[2].mxu0  ;;  %v821_v6 = vpop.f32.mrb[2].mxu1 }
 0x11c   :  { %v251_v7 = vsub.f32 %v804_v60, %v180_v5  ;;  %v315_v8 = vsub.f32 %v804_v60, %v821_v6  ;;  %v182_v9 = vpop.f32.mrb[3].mxu0  ;;  %v826_v10 = vpop.f32.mrb[3].mxu1 }
 0x11d   :  { %v252_v12 = vsub.f32 %v810_v63, %v182_v9  ;;  %v316_v13 = vsub.f32 %v810_v63, %v826_v10 }
 0x11e   :  { %v253_v15 = vand.u32 2147483647, %v251_v7 }
 0x11f   :  { %v254_v16 = vand.u32 2147483647, %v252_v12  ;;  %v186_v17 = vpop.f32.mrb[4].mxu0  ;;  %v835_v18 = vpop.f32.mrb[4].mxu1 }
 0x120   :  { %v279_v19 = vsub.f32 %v804_v60, %v186_v17  ;;  %v321_v20 = vsub.f32 %v804_v60, %v835_v18  ;;  %v188_v21 = vpop.f32.mrb[5].mxu0  ;;  %v230_v22 = vpop.f32.mrb[5].mxu1  ;;  %v267_v23 = vmul.f32 %v260_v11, %v253_v15 }
 0x121   :  { %v280_v24 = vsub.f32 %v810_v63, %v188_v21  ;;  %v322_v25 = vsub.f32 %v810_v63, %v230_v22  ;;  %v268_v26 = vmul.f32 %v264_v14, %v254_v16  ;;  %v311_v22 = vand.u32 2147483647, %v309_v62 }
 0x122   :  { %v281_v36 = vand.u32 2147483647, %v279_v19 }
 0x123   :  { %v192_v27 = vpop.f32.mrb[6].mxu0  ;;  %v234_v28 = vpop.f32.mrb[6].mxu1  ;;  %v269_v29 = vadd.f32 %v268_v26, %v267_v23  ;;  %v282_v38 = vand.u32 2147483647, %v280_v24  ;;  %v312_v24 = vand.u32 2147483647, %v310_v2 }
 0x124   :  { %v285_v30 = vsub.f32 %v804_v60, %v192_v27  ;;  %v327_v31 = vsub.f32 %v804_v60, %v234_v28  ;;  %v194_v32 = vpop.f32.mrb[7].mxu0  ;;  %v236_v33 = vpop.f32.mrb[7].mxu1  ;;  %v317_v27 = vand.u32 2147483647, %v315_v8  ;;  %v324_v61 = vand.u32 2147483647, %v322_v25 }
 0x125   :  { %v286_v34 = vsub.f32 %v810_v63, %v194_v32  ;;  %v328_v35 = vsub.f32 %v810_v63, %v236_v33  ;;  %270 = vadd.xlane.f32.xlu0 %v269_v29  ;;  %v318_v29 = vand.u32 2147483647, %v316_v13  ;;  %v323_v32 = vand.u32 2147483647, %v321_v20  ;;  %v345_v2 = vld [vmem:[%s890_s3] sm:$0x3] }
 0x126   :  { %v287_v37 = vand.u32 2147483647, %v285_v30  ;;  %v350_v10 = vrot.slane %v345_v2, %v259_v1  ;;  %v354_v25 = vrot.slane %v345_v2, %v263_v4 }
 0x127   :  { %v288_v39 = vand.u32 2147483647, %v286_v34  ;;  %v198_v40 = vpop.f32.mrb[8].mxu0  ;;  %v240_v41 = vpop.f32.mrb[8].mxu1  ;;  %v329_v34 = vand.u32 2147483647, %v327_v31 }
 0x128   :  { %v289_v42 = vadd.f32 %v287_v37, %v281_v36  ;;  %v291_v43 = vsub.f32 %v804_v60, %v198_v40  ;;  %v333_v44 = vsub.f32 %v804_v60, %v240_v41  ;;  %v200_v45 = vpop.f32.mrb[9].mxu0  ;;  %v242_v46 = vpop.f32.mrb[9].mxu1  ;;  %v330_v37 = vand.u32 2147483647, %v328_v35 }
 0x129   :  { %v290_v47 = vadd.f32 %v288_v39, %v282_v38  ;;  %v292_v48 = vsub.f32 %v810_v63, %v200_v45  ;;  %v334_v49 = vsub.f32 %v810_v63, %v242_v46 }
 0x12a   :  { %v293_v50 = vand.u32 2147483647, %v291_v43 }
 0x12b   :  { %v294_v51 = vand.u32 2147483647, %v292_v48  ;;  %v204_v52 = vpop.f32.mrb[10].mxu0  ;;  %v246_v53 = vpop.f32.mrb[10].mxu1  ;;  %v336_v8 = vand.u32 2147483647, %v334_v49 }
 0x12c   :  { %v295_v54 = vadd.f32 %v293_v50, %v289_v42  ;;  %v297_v55 = vsub.f32 %v804_v60, %v204_v52  ;;  %v339_v56 = vsub.f32 %v804_v60, %v246_v53  ;;  %v206_v57 = vpop.f32.mrb[11].mxu0  ;;  %v248_v58 = vpop.f32.mrb[11].mxu1 }
 0x12d   :  { %v296_v3 = vadd.f32 %v294_v51, %v290_v47  ;;  %v298_v5 = vsub.f32 %v810_v63, %v206_v57  ;;  %v340_v7 = vsub.f32 %v810_v63, %v248_v58 }
 0x12e   :  { %v299_v9 = vand.u32 2147483647, %v297_v55  ;;  %v341_v39 = vand.u32 2147483647, %v339_v56 }
 0x12f   :  { %v300_v11 = vand.u32 2147483647, %v298_v5  ;;  %v210_v12 = vpop.f32.mrb[12].mxu0  ;;  %v342_v13 = vand.u32 2147483647, %v340_v7 }
 0x130   :  { %v301_v14 = vadd.f32 %v299_v9, %v295_v54  ;;  %v303_v15 = vsub.f32 %v804_v60, %v210_v12  ;;  %v212_v16 = vpop.f32.mrb[13].mxu0  ;;  %v335_v60 = vand.u32 2147483647, %v333_v44 }
 0x131   :  { %v302_v17 = vadd.f32 %v300_v11, %v296_v3  ;;  %v304_v18 = vsub.f32 %v810_v63, %v212_v16 }
 0x132   :  { %v305_v19 = vand.u32 2147483647, %v303_v15 }
 0x133   :  { %v306_v21 = vand.u32 2147483647, %v304_v18 }
 0x134   :  { %v307_v23 = vadd.f32 %v305_v19, %v301_v14 }
 0x135   :  { %v308_v26 = vadd.f32 %v306_v21, %v302_v17 }
 0x136   :  { %v313_v28 = vadd.f32 %v311_v22, %v307_v23 }
 0x137   :  { %v314_v30 = vadd.f32 %v312_v24, %v308_v26 }
 0x138   :  { %v319_v33 = vadd.f32 %v317_v27, %v313_v28 }
 0x139   :  { %v320_v62 = vadd.f32 %v318_v29, %v314_v30 }
 0x13a   :  { %v325_v36 = vadd.f32 %v323_v32, %v319_v33 }
 0x13b   :  { %v326_v0 = vadd.f32 %v324_v61, %v320_v62 }
 0x13c   :  { %v331_v6 = vadd.f32 %v329_v34, %v325_v36 }
 0x13d   :  { %v332_v38 = vadd.f32 %v330_v37, %v326_v0 }
 0x13e   :  { %v337_v63 = vadd.f32 %v335_v60, %v331_v6 }
 0x13f   :  { %v338_v20 = vadd.f32 %v336_v8, %v332_v38 }
 0x140   :  { %v343_v31 = vadd.f32 %v341_v39, %v337_v63 }
 0x141   :  { %v344_v35 = vadd.f32 %v342_v13, %v338_v20 }
 0x142   :  { %v357_v40 = vmul.f32 %v350_v10, %v343_v31 }
 0x143   :  { %v358_v41 = vmul.f32 %v354_v25, %v344_v35 }
 0x145   :  { %v359_v42 = vadd.f32 %v358_v41, %v357_v40 }
 0x147   :  { %360 = vadd.xlane.f32.xlu0 %v359_v42 }
 0x1b2   :  { %v271_v43 = vpop.xlane.xlu0 %270 }
 0x1b3   :  { %v272_v44 = vrot.slane %v271_v43, 4 }
 0x1b5   :  { %v273_v45 = vadd.f32 %v272_v44, %v271_v43 }
 0x1b7   :  { %v274_v46 = vrot.slane %v273_v45, 2 }
 0x1b9   :  { %v275_v47 = vadd.f32 %v274_v46, %v273_v45 }
 0x1bb   :  { %v276_v48 = vrot.slane %v275_v47, 1 }
 0x1bd   :  { %v277_v49 = vadd.f32 %v276_v48, %v275_v47 }
 0x1bf   :  { %485 = vpush %v277_v49 }
 0x1d4   :  { %v361_v1 = vpop.xlane.xlu0 %360 }
 0x1d5   :  { %v362_v50 = vrot.slane %v361_v1, 4 }
 0x1d7   :  { %v363_v51 = vadd.f32 %v362_v50, %v361_v1 }
 0x1d9   :  { %v364_v52 = vrot.slane %v363_v51, 2 }
 0x1db   :  { %v365_v59 = vadd.f32 %v364_v52, %v363_v51 }
 0x1dd   :  { %v366_v4 = vrot.slane %v365_v59, 1 }
 0x1df   :  { %v367_v53 = vadd.f32 %v366_v4, %v365_v59 }
 0x1e1   :  { %487 = vpush %v367_v53 }
 0x1f0   :  { %s486_s3 = spop %485 }
 0x212   :  { %s488_s13 = spop %487 }
 0x213   :  { %s369_s14 = sadd.f32 3e-07, %s488_s13 }
 0x215   :  { %v370_v54 = vstv %s369_s14 }
 0x216   :  { %492 = vrcp.f32 %v370_v54 }
 0x220   :  { %v493_v55 = vpop.eup %492 }
 0x221   :  { %489 = vpush %v493_v55 }
 0x252   :  { %s490_s15 = spop %489 }
 0x253   :  { %s373_s16 = smul.f32 %s490_s15, %s486_s3 }
 0x255   :  { %375 = sst [smem:[#allocation2]] %s373_s16 }
 0x256   :  { %503 = shalt.err (!%p500_p2)
}
 0x257   :  { %s506_s23 = smov [#allocation2]  }
 0x258   :  { %383 = dma.smem_to_hbm %s506_s23, 16, %s891_s4, [#allocation3]  }
 0x259   :  { %504 = dma.done.wait [#allocation3], 16  }
 0x25a   :  { %505 = vsyncadd [#allocation3], 4294967280 }
 0x25b   :  { %387 = sfence }
 0x25c   :  { %388 = vsyncpa [#allocation3], 1 }

</bundles_post_ra>
